<compile_context>
chip_gen: v6e
topology: v6e:2x2x1
jax: 0.10.0
libtpu: 0.0.40
codegen_flags: <defaults>
</compile_context>

<pallas_src>
import functools

import jax
import jax.numpy as jnp
from jax.experimental import pallas as pl
from jax.experimental.pallas import tpu as pltpu

BN_EPS = 1e-5
_INV_SQRT2 = 0.7071067811865476


def _gelu_exact(x):
    # PyTorch F.gelu / nn.GELU() default: exact erf formulation.
    return 0.5 * x * (1.0 + jax.lax.erf(x * jnp.float32(_INV_SQRT2)))


def _pick_block_b(B, cap=16):
    """Largest divisor of B <= cap (batch elements handled per grid step)."""
    best = 1
    for d in range(1, min(B, cap) + 1):
        if B % d == 0:
            best = d
    return best


# --------------------------------------------------------------------------
# Shared per-batch-element conv + bias + GELU (both branches fused via the
# block-diagonal frame|motion weight packed into one 128-lane slab).
# --------------------------------------------------------------------------
def _conv_gelu_one(xp_ref, w_ref, b_ref, bb, *, K, stride, T_out):
    """Returns GELU(Conv1d(x_bb) + bias) as (T_out, Wp) f32.

    xp_ref: (Bb, Tp, D)  bf16 time-padded input block
    w_ref:  (K, D, Wp)   bf16 per-tap block-diagonal weights
    b_ref:  (1, Wp)      f32 packed conv bias (zeros in pad lanes)
    """
    if stride == 1:
        # One aligned full-tile load; K full-row MXU matmuls (bf16 x bf16 -> f32);
        # tap shift applied as a static, offset-k slice of the f32 result.
        xb = xp_ref[bb, :, :]                                   # (Tp, D) bf16
        acc = None
        for k in range(K):                                      # K tiny, unrolled
            p = jnp.dot(xb, w_ref[k], preferred_element_type=jnp.float32)
            pk = p[k:k + T_out, :]                              # rows t+k -> out row t
            acc = pk if acc is None else acc + pk
    else:
        acc = None
        for k in range(K):
            xk = xp_ref[bb, pl.ds(k, T_out, stride=stride), :]  # (T_out, D) bf16
            p = jnp.dot(xk, w_ref[k], preferred_element_type=jnp.float32)
            acc = p if acc is None else acc + p
    return _gelu_exact(acc + b_ref[...])                        # (T_out, Wp) f32


# --------------------------------------------------------------------------
# Pass 1: per-block partial BatchNorm statistics (sum + centered M2).
# Grid is 'parallel' over batch blocks; each block writes its own stats row.
# --------------------------------------------------------------------------
def stats_kernel(xp_ref, w_ref, b_ref, stats_ref, *, K, stride, T_out, Bb):
    """stats_ref: (2, Wp)  row0 = sum(y), row1 = sum((y - mean_block)^2)."""
    inv_t = jnp.float32(1.0 / T_out)
    n = None
    S = None
    M2 = None
    for bb in range(Bb):                                        # Bb small, unrolled
        y = _conv_gelu_one(xp_ref, w_ref, b_ref, bb,
                           K=K, stride=stride, T_out=T_out)     # (T_out, Wp) f32
        s_bb = jnp.sum(y, axis=0, keepdims=True)                # (1, Wp)
        mean_bb = s_bb * inv_t
        m2_bb = jnp.sum(jnp.square(y - mean_bb), axis=0, keepdims=True)
        if S is None:
            n, S, M2 = T_out, s_bb, m2_bb
        else:
            # Chan parallel-variance combine (numerically stable partials).
            n_new = n + T_out
            delta = mean_bb - S * jnp.float32(1.0 / n)
            M2 = M2 + m2_bb + jnp.square(delta) * jnp.float32(n * T_out / n_new)
            S = S + s_bb
            n = n_new
    stats_ref[0:1, :] = S
    stats_ref[1:2, :] = M2


# --------------------------------------------------------------------------
# Pass 2: recompute conv+GELU, apply pre-folded BN scale/shift, fuse branches,
# store H-wide (full last dim, no padded store, no wrapper slice).
# --------------------------------------------------------------------------
def apply_kernel(xp_ref, w_ref, b_ref, ss_ref, o_ref, *, K, stride, T_out, H, Bb):
    """ss_ref: (2, Wp) packed [scale; shift].  o_ref: (Bb, T_out, H)."""
    scale = ss_ref[0:1, :]
    shift = ss_ref[1:2, :]
    for bb in range(Bb):
        y = _conv_gelu_one(xp_ref, w_ref, b_ref, bb,
                           K=K, stride=stride, T_out=T_out)     # (T_out, Wp) f32
        z = y * scale + shift                                   # BN as one FMA
        f = z[:, :H]                                            # frame lanes
        m = z[:, H:2 * H]                                       # motion lanes
        o_ref[bb, :, :] = _gelu_exact(f + m) - jnp.square(f - m)


# --------------------------------------------------------------------------
# Wrapper
# --------------------------------------------------------------------------
def video_fusion_initializer(visual_feat, params, kernel_size, stride, padding):
    B, T, D = visual_feat.shape
    fw, mw = params["frame_w"], params["motion_w"]    # (H, Cf, K), (H, Cm, K)
    H, Cf, K = fw.shape
    Cm = mw.shape[1]
    assert K == kernel_size and Cf + Cm == D
    assert 2 * H <= 128, "frame|motion packing assumes both branches fit 128 lanes"
    Wp = 128                                           # single lane-dense slab
    T_out = (T + 2 * padding - K) // stride + 1
    Tp = T + 2 * padding

    Bb = _pick_block_b(B)                              # batch elements per grid step
    n_blocks = B // Bb

    # Only remaining input glue: time pad (conv boundary) + bf16 MXU-operand cast.
    xp = jnp.pad(visual_feat.astype(jnp.float32),
                 ((0, 0), (padding, padding), (0, 0))).astype(jnp.bfloat16)

    # Block-diagonal per-tap weights: frame channels feed lanes [0, H),
    # motion channels feed lanes [H, 2H); lanes [2H, 128) are exactly zero.
    W = jnp.zeros((K, D, Wp), jnp.float32)
    W = W.at[:, :Cf, :H].set(jnp.transpose(fw, (2, 1, 0)).astype(jnp.float32))
    W = W.at[:, Cf:, H:2 * H].set(jnp.transpose(mw, (2, 1, 0)).astype(jnp.float32))
    W = W.astype(jnp.bfloat16)

    bias = jnp.zeros((1, Wp), jnp.float32)
    bias = bias.at[0, :H].set(params["frame_b"].astype(jnp.float32))
    bias = bias.at[0, H:2 * H].set(params["motion_b"].astype(jnp.float32))

    gamma = jnp.zeros((Wp,), jnp.float32)
    gamma = gamma.at[:H].set(params["frame_gamma"].astype(jnp.float32))
    gamma = gamma.at[H:2 * H].set(params["motion_gamma"].astype(jnp.float32))
    beta = jnp.zeros((Wp,), jnp.float32)
    beta = beta.at[:H].set(params["frame_beta"].astype(jnp.float32))
    beta = beta.at[H:2 * H].set(params["motion_beta"].astype(jnp.float32))

    # ---------------- Pass 1: per-block partial BN stats -------------------
    cost_a = pl.CostEstimate(
        flops=2 * B * Tp * K * D * Wp + 8 * B * T_out * Wp,
        transcendentals=B * T_out * Wp,
        bytes_accessed=(xp.size * 2 + n_blocks * (W.size * 2 + bias.size * 4)
                        + n_blocks * 2 * Wp * 4))

    partial = pl.pallas_call(
        functools.partial(stats_kernel, K=K, stride=stride, T_out=T_out, Bb=Bb),
        out_shape=jax.ShapeDtypeStruct((n_blocks, 2, Wp), jnp.float32),
        grid_spec=pltpu.PrefetchScalarGridSpec(
            num_scalar_prefetch=0,
            grid=(n_blocks,),
            in_specs=[
                pl.BlockSpec((Bb, Tp, D), lambda b: (b, 0, 0)),
                pl.BlockSpec((K, D, Wp), lambda b: (0, 0, 0)),
                pl.BlockSpec((1, Wp), lambda b: (0, 0)),
            ],
            out_specs=pl.BlockSpec((None, 2, Wp), lambda b: (b, 0, 0)),
        ),
        compiler_params=pltpu.CompilerParams(
            dimension_semantics=("parallel",),    # both TCs can run the conv pass
            vmem_limit_bytes=32 * 1024 * 1024),
        cost_estimate=cost_a,
    )(xp, W, bias)

    # ---- Reduce partial stats + fold BN into scale/shift (tiny, pure JAX) ----
    n_b = Bb * T_out
    N = B * T_out
    S_j = partial[:, 0, :]                                      # (n_blocks, Wp)
    M2_j = partial[:, 1, :]
    S = jnp.sum(S_j, axis=0)
    mean = S / N
    mean_j = S_j / n_b
    M2 = jnp.sum(M2_j, axis=0) + n_b * jnp.sum(
        jnp.square(mean_j - mean[None, :]), axis=0)
    var = jnp.maximum(M2 / N, 0.0)             # biased var, as BN train-mode norm
    scale = gamma * jax.lax.rsqrt(var + BN_EPS)
    shift = beta - mean * scale
    ss = jnp.stack([scale, shift], axis=0)                      # (2, Wp) f32

    # -------- Pass 2: recompute conv+GELU, apply BN, fuse, store H-wide --------
    cost_b = pl.CostEstimate(
        flops=2 * B * Tp * K * D * Wp + B * T_out * (2 * Wp + 8 * H),
        transcendentals=B * T_out * (Wp + H),
        bytes_accessed=(xp.size * 2
                        + n_blocks * (W.size * 2 + bias.size * 4 + ss.size * 4)
                        + B * T_out * H * 4))

    out = pl.pallas_call(
        functools.partial(apply_kernel, K=K, stride=stride,
                          T_out=T_out, H=H, Bb=Bb),
        out_shape=jax.ShapeDtypeStruct((B, T_out, H), jnp.float32),
        grid_spec=pltpu.PrefetchScalarGridSpec(
            num_scalar_prefetch=0,
            grid=(n_blocks,),
            in_specs=[
                pl.BlockSpec((Bb, Tp, D), lambda b: (b, 0, 0)),
                pl.BlockSpec((K, D, Wp), lambda b: (0, 0, 0)),
                pl.BlockSpec((1, Wp), lambda b: (0, 0)),
                pl.BlockSpec((2, Wp), lambda b: (0, 0)),
            ],
            out_specs=pl.BlockSpec((Bb, T_out, H), lambda b: (b, 0, 0)),
        ),
        compiler_params=pltpu.CompilerParams(
            dimension_semantics=("parallel",),
            vmem_limit_bytes=32 * 1024 * 1024),
        cost_estimate=cost_b,
    )(xp, W, bias, ss)

    return out


# --------------------------------------------------------------------------
# Plain-JAX reference of the same math (bf16 matmul operands, f32 accumulate,
# matching the kernel's documented precision choice).  Sanity check only.
# --------------------------------------------------------------------------
def _im2col(xpad, K, stride, T_out):
    cols = jnp.concatenate(
        [xpad[:, k:k + (T_out - 1) * stride + 1:stride, :] for k in range(K)],
        axis=-1)
    return cols.reshape(-1, cols.shape[-1])


def _reference(visual_feat, params, kernel_size, stride, padding):
    B, T, D = visual_feat.shape
    H = params["frame_w"].shape[0]
    T_out = (T + 2 * padding - kernel_size) // stride + 1
    frame_raw, motion_raw = jnp.split(visual_feat.astype(jnp.float32), 2, axis=-1)

    def branch(x, w, b, g, bt):
        xpad = jnp.pad(x, ((0, 0), (padding, padding), (0, 0)))
        cols = _im2col(xpad, kernel_size, stride, T_out)          # (B*T_out, K*C)
        wm = jnp.transpose(w, (2, 1, 0)).reshape(-1, H)           # (K*C, H)
        y = jnp.dot(cols.astype(jnp.bfloat16), wm.astype(jnp.bfloat16),
                    preferred_element_type=jnp.float32) + b[None, :].astype(jnp.float32)
        y = _gelu_exact(y)
        mu = jnp.mean(y, axis=0, keepdims=True)
        var = jnp.mean(jnp.square(y - mu), axis=0, keepdims=True)
        return (y - mu) * jax.lax.rsqrt(var + BN_EPS) * g[None, :] + bt[None, :]

    f = branch(frame_raw, params["frame_w"], params["frame_b"],
               params["frame_gamma"], params["frame_beta"])
    m = branch(motion_raw, params["motion_w"], params["motion_b"],
               params["motion_gamma"], params["motion_beta"])
    out = _gelu_exact(f + m) - jnp.square(f - m)
    return out.reshape(B, T_out, H)


if __name__ == "__main__":
    # Small, module-consistent shapes.
    B, T = 2, 8
    frame_dim = motion_dim = 16          # visual_feat last dim = 32, chunked in 2
    hidden_dim = 32
    kernel_size, stride, padding = 3, 1, 1

    key = jax.random.PRNGKey(0)
    ks = jax.random.split(key, 7)
    visual_feat = jax.random.normal(
        ks[0], (B, T, frame_dim + motion_dim), jnp.float32)

    params = {
        "frame_w": 0.1 * jax.random.normal(
            ks[1], (hidden_dim, frame_dim, kernel_size), jnp.float32),
        "frame_b": 0.1 * jax.random.normal(ks[2], (hidden_dim,), jnp.float32),
        "frame_gamma": jnp.ones((hidden_dim,), jnp.float32),
        "frame_beta": jnp.zeros((hidden_dim,), jnp.float32),
        "motion_w": 0.1 * jax.random.normal(
            ks[3], (hidden_dim, motion_dim, kernel_size), jnp.float32),
        "motion_b": 0.1 * jax.random.normal(ks[4], (hidden_dim,), jnp.float32),
        "motion_gamma": jnp.ones((hidden_dim,), jnp.float32),
        "motion_beta": jnp.zeros((hidden_dim,), jnp.float32),
    }

    out = video_fusion_initializer(visual_feat, params,
                                   kernel_size, stride, padding)
    out = jax.block_until_ready(out)

    ref = _reference(visual_feat, params, kernel_size, stride, padding)
    assert out.shape == (B, T, hidden_dim)
    assert jnp.allclose(out, ref, rtol=1e-4, atol=1e-4), "mismatch vs reference"

    print("KERNEL_OK")
</pallas_src>

<mosaic_0001>
module attributes {stable_mosaic.version = 11 : i64} {
  func.func @stats_kernel(%arg0: i32, %arg1: memref<2x10x32xbf16, #tpu.memory_space<vmem>>, %arg2: memref<3x32x128xbf16, #tpu.memory_space<vmem>>, %arg3: memref<1x128xf32, #tpu.memory_space<vmem>>, %arg4: memref<1x2x128xf32, #tpu.memory_space<vmem>>) attributes {dimension_semantics = [#tpu.dimension_semantics<parallel>], iteration_bounds = array<i64: 1>, scalar_prefetch = 0 : i64, scratch_operands = 0 : i64, tpu.core_type = #tpu.core_type<tc>, window_params = [{transform_indices = @transform_0, window_bounds = array<i64: 2, 10, 32>}, {pipeline_mode = #tpu.pipeline_mode<synchronous>, transform_indices = @transform_1, window_bounds = array<i64: 3, 32, 128>}, {pipeline_mode = #tpu.pipeline_mode<synchronous>, transform_indices = @transform_2, window_bounds = array<i64: 1, 128>}, {transform_indices = @transform_3, window_bounds = array<i64: 1, 2, 128>}]} {
    %c0 = arith.constant 0 : index
    %c0_0 = arith.constant 0 : index
    %c0_1 = arith.constant 0 : index
    %0 = vector.load %arg1[%c0, %c0_0, %c0_1] : memref<2x10x32xbf16, #tpu.memory_space<vmem>>, vector<1x10x32xbf16>
    %1 = vector.shape_cast %0 : vector<1x10x32xbf16> to vector<10x32xbf16>
    %c0_2 = arith.constant 0 : index
    %c0_3 = arith.constant 0 : index
    %c0_4 = arith.constant 0 : index
    %2 = vector.load %arg2[%c0_2, %c0_3, %c0_4] : memref<3x32x128xbf16, #tpu.memory_space<vmem>>, vector<1x32x128xbf16>
    %3 = vector.shape_cast %2 : vector<1x32x128xbf16> to vector<32x128xbf16>
    %cst = arith.constant dense<0.000000e+00> : vector<10x128xf32>
    %4 = tpu.matmul %1, %3, %cst {dimension_numbers = #tpu.dot_dimension_numbers<[1], [0], [0], [1], [0, 0, 1, 1], [], []>} : vector<10x32xbf16>, vector<32x128xbf16>, vector<10x128xf32> -> vector<10x128xf32>
    %5 = vector.extract_strided_slice %4 {offsets = [0, 0], sizes = [8, 128], strides = [1, 1]} : vector<10x128xf32> to vector<8x128xf32>
    %c1 = arith.constant 1 : index
    %c0_5 = arith.constant 0 : index
    %c0_6 = arith.constant 0 : index
    %6 = vector.load %arg2[%c1, %c0_5, %c0_6] : memref<3x32x128xbf16, #tpu.memory_space<vmem>>, vector<1x32x128xbf16>
    %7 = vector.shape_cast %6 : vector<1x32x128xbf16> to vector<32x128xbf16>
    %cst_7 = arith.constant dense<0.000000e+00> : vector<10x128xf32>
    %8 = tpu.matmul %1, %7, %cst_7 {dimension_numbers = #tpu.dot_dimension_numbers<[1], [0], [0], [1], [0, 0, 1, 1], [], []>} : vector<10x32xbf16>, vector<32x128xbf16>, vector<10x128xf32> -> vector<10x128xf32>
    %9 = vector.extract_strided_slice %8 {offsets = [1, 0], sizes = [8, 128], strides = [1, 1]} : vector<10x128xf32> to vector<8x128xf32>
    %10 = arith.addf %5, %9 : vector<8x128xf32>
    %c2 = arith.constant 2 : index
    %c0_8 = arith.constant 0 : index
    %c0_9 = arith.constant 0 : index
    %11 = vector.load %arg2[%c2, %c0_8, %c0_9] : memref<3x32x128xbf16, #tpu.memory_space<vmem>>, vector<1x32x128xbf16>
    %12 = vector.shape_cast %11 : vector<1x32x128xbf16> to vector<32x128xbf16>
    %cst_10 = arith.constant dense<0.000000e+00> : vector<10x128xf32>
    %13 = tpu.matmul %1, %12, %cst_10 {dimension_numbers = #tpu.dot_dimension_numbers<[1], [0], [0], [1], [0, 0, 1, 1], [], []>} : vector<10x32xbf16>, vector<32x128xbf16>, vector<10x128xf32> -> vector<10x128xf32>
    %14 = vector.extract_strided_slice %13 {offsets = [2, 0], sizes = [8, 128], strides = [1, 1]} : vector<10x128xf32> to vector<8x128xf32>
    %15 = arith.addf %10, %14 : vector<8x128xf32>
    %c0_11 = arith.constant 0 : index
    %c0_12 = arith.constant 0 : index
    %16 = vector.load %arg3[%c0_11, %c0_12] : memref<1x128xf32, #tpu.memory_space<vmem>>, vector<1x128xf32>
    %17 = vector.broadcast %16 : vector<1x128xf32> to vector<8x128xf32>
    %18 = arith.addf %15, %17 : vector<8x128xf32>
    %cst_13 = arith.constant 5.000000e-01 : f32
    %19 = vector.broadcast %cst_13 : f32 to vector<8x128xf32>
    %20 = arith.mulf %19, %18 : vector<8x128xf32>
    %cst_14 = arith.constant 0.707106769 : f32
    %21 = vector.broadcast %cst_14 : f32 to vector<8x128xf32>
    %22 = arith.mulf %18, %21 : vector<8x128xf32>
    %23 = math.erf %22 : vector<8x128xf32>
    %cst_15 = arith.constant 1.000000e+00 : f32
    %24 = vector.broadcast %cst_15 : f32 to vector<8x128xf32>
    %25 = arith.addf %24, %23 : vector<8x128xf32>
    %26 = arith.mulf %20, %25 : vector<8x128xf32>
    %cst_16 = arith.constant dense<0.000000e+00> : vector<128xf32>
    %27 = vector.multi_reduction <add>, %26, %cst_16 [0] : vector<8x128xf32> to vector<128xf32>
    %28 = vector.shape_cast %27 : vector<128xf32> to vector<1x128xf32>
    %cst_17 = arith.constant 1.250000e-01 : f32
    %29 = vector.broadcast %cst_17 : f32 to vector<1x128xf32>
    %30 = arith.mulf %28, %29 : vector<1x128xf32>
    %31 = vector.broadcast %30 : vector<1x128xf32> to vector<8x128xf32>
    %32 = arith.subf %26, %31 : vector<8x128xf32>
    %33 = arith.mulf %32, %32 : vector<8x128xf32>
    %cst_18 = arith.constant dense<0.000000e+00> : vector<128xf32>
    %34 = vector.multi_reduction <add>, %33, %cst_18 [0] : vector<8x128xf32> to vector<128xf32>
    %35 = vector.shape_cast %34 : vector<128xf32> to vector<1x128xf32>
    %c1_19 = arith.constant 1 : index
    %c0_20 = arith.constant 0 : index
    %c0_21 = arith.constant 0 : index
    %36 = vector.load %arg1[%c1_19, %c0_20, %c0_21] : memref<2x10x32xbf16, #tpu.memory_space<vmem>>, vector<1x10x32xbf16>
    %37 = vector.shape_cast %36 : vector<1x10x32xbf16> to vector<10x32xbf16>
    %c0_22 = arith.constant 0 : index
    %c0_23 = arith.constant 0 : index
    %c0_24 = arith.constant 0 : index
    %38 = vector.load %arg2[%c0_22, %c0_23, %c0_24] : memref<3x32x128xbf16, #tpu.memory_space<vmem>>, vector<1x32x128xbf16>
    %39 = vector.shape_cast %38 : vector<1x32x128xbf16> to vector<32x128xbf16>
    %cst_25 = arith.constant dense<0.000000e+00> : vector<10x128xf32>
    %40 = tpu.matmul %37, %39, %cst_25 {dimension_numbers = #tpu.dot_dimension_numbers<[1], [0], [0], [1], [0, 0, 1, 1], [], []>} : vector<10x32xbf16>, vector<32x128xbf16>, vector<10x128xf32> -> vector<10x128xf32>
    %41 = vector.extract_strided_slice %40 {offsets = [0, 0], sizes = [8, 128], strides = [1, 1]} : vector<10x128xf32> to vector<8x128xf32>
    %c1_26 = arith.constant 1 : index
    %c0_27 = arith.constant 0 : index
    %c0_28 = arith.constant 0 : index
    %42 = vector.load %arg2[%c1_26, %c0_27, %c0_28] : memref<3x32x128xbf16, #tpu.memory_space<vmem>>, vector<1x32x128xbf16>
    %43 = vector.shape_cast %42 : vector<1x32x128xbf16> to vector<32x128xbf16>
    %cst_29 = arith.constant dense<0.000000e+00> : vector<10x128xf32>
    %44 = tpu.matmul %37, %43, %cst_29 {dimension_numbers = #tpu.dot_dimension_numbers<[1], [0], [0], [1], [0, 0, 1, 1], [], []>} : vector<10x32xbf16>, vector<32x128xbf16>, vector<10x128xf32> -> vector<10x128xf32>
    %45 = vector.extract_strided_slice %44 {offsets = [1, 0], sizes = [8, 128], strides = [1, 1]} : vector<10x128xf32> to vector<8x128xf32>
    %46 = arith.addf %41, %45 : vector<8x128xf32>
    %c2_30 = arith.constant 2 : index
    %c0_31 = arith.constant 0 : index
    %c0_32 = arith.constant 0 : index
    %47 = vector.load %arg2[%c2_30, %c0_31, %c0_32] : memref<3x32x128xbf16, #tpu.memory_space<vmem>>, vector<1x32x128xbf16>
    %48 = vector.shape_cast %47 : vector<1x32x128xbf16> to vector<32x128xbf16>
    %cst_33 = arith.constant dense<0.000000e+00> : vector<10x128xf32>
    %49 = tpu.matmul %37, %48, %cst_33 {dimension_numbers = #tpu.dot_dimension_numbers<[1], [0], [0], [1], [0, 0, 1, 1], [], []>} : vector<10x32xbf16>, vector<32x128xbf16>, vector<10x128xf32> -> vector<10x128xf32>
    %50 = vector.extract_strided_slice %49 {offsets = [2, 0], sizes = [8, 128], strides = [1, 1]} : vector<10x128xf32> to vector<8x128xf32>
    %51 = arith.addf %46, %50 : vector<8x128xf32>
    %c0_34 = arith.constant 0 : index
    %c0_35 = arith.constant 0 : index
    %52 = vector.load %arg3[%c0_34, %c0_35] : memref<1x128xf32, #tpu.memory_space<vmem>>, vector<1x128xf32>
    %53 = vector.broadcast %52 : vector<1x128xf32> to vector<8x128xf32>
    %54 = arith.addf %51, %53 : vector<8x128xf32>
    %cst_36 = arith.constant 5.000000e-01 : f32
    %55 = vector.broadcast %cst_36 : f32 to vector<8x128xf32>
    %56 = arith.mulf %55, %54 : vector<8x128xf32>
    %cst_37 = arith.constant 0.707106769 : f32
    %57 = vector.broadcast %cst_37 : f32 to vector<8x128xf32>
    %58 = arith.mulf %54, %57 : vector<8x128xf32>
    %59 = math.erf %58 : vector<8x128xf32>
    %cst_38 = arith.constant 1.000000e+00 : f32
    %60 = vector.broadcast %cst_38 : f32 to vector<8x128xf32>
    %61 = arith.addf %60, %59 : vector<8x128xf32>
    %62 = arith.mulf %56, %61 : vector<8x128xf32>
    %cst_39 = arith.constant dense<0.000000e+00> : vector<128xf32>
    %63 = vector.multi_reduction <add>, %62, %cst_39 [0] : vector<8x128xf32> to vector<128xf32>
    %64 = vector.shape_cast %63 : vector<128xf32> to vector<1x128xf32>
    %cst_40 = arith.constant 1.250000e-01 : f32
    %65 = vector.broadcast %cst_40 : f32 to vector<1x128xf32>
    %66 = arith.mulf %64, %65 : vector<1x128xf32>
    %67 = vector.broadcast %66 : vector<1x128xf32> to vector<8x128xf32>
    %68 = arith.subf %62, %67 : vector<8x128xf32>
    %69 = arith.mulf %68, %68 : vector<8x128xf32>
    %cst_41 = arith.constant dense<0.000000e+00> : vector<128xf32>
    %70 = vector.multi_reduction <add>, %69, %cst_41 [0] : vector<8x128xf32> to vector<128xf32>
    %71 = vector.shape_cast %70 : vector<128xf32> to vector<1x128xf32>
    %cst_42 = arith.constant 1.250000e-01 : f32
    %72 = vector.broadcast %cst_42 : f32 to vector<1x128xf32>
    %73 = arith.mulf %28, %72 : vector<1x128xf32>
    %74 = arith.subf %66, %73 : vector<1x128xf32>
    %75 = arith.addf %35, %71 : vector<1x128xf32>
    %76 = arith.mulf %74, %74 : vector<1x128xf32>
    %cst_43 = arith.constant 4.000000e+00 : f32
    %77 = vector.broadcast %cst_43 : f32 to vector<1x128xf32>
    %78 = arith.mulf %76, %77 : vector<1x128xf32>
    %79 = arith.addf %75, %78 : vector<1x128xf32>
    %80 = arith.addf %28, %64 : vector<1x128xf32>
    %c0_44 = arith.constant 0 : index
    %c0_45 = arith.constant 0 : index
    %c0_46 = arith.constant 0 : index
    %81 = vector.load %arg4[%c0_44, %c0_45, %c0_46] : memref<1x2x128xf32, #tpu.memory_space<vmem>>, vector<1x1x128xf32>
    %82 = vector.shape_cast %81 : vector<1x1x128xf32> to vector<1x128xf32>
    %83 = vector.shape_cast %80 : vector<1x128xf32> to vector<1x1x128xf32>
    tpu.vector_store %arg4[%c0_44, %c0_45, %c0_46], %83 {strides = array<i32>} : memref<1x2x128xf32, #tpu.memory_space<vmem>>, vector<1x1x128xf32>,
    %c0_47 = arith.constant 0 : index
    %c1_48 = arith.constant 1 : index
    %c0_49 = arith.constant 0 : index
    %84 = vector.load %arg4[%c0_47, %c1_48, %c0_49] : memref<1x2x128xf32, #tpu.memory_space<vmem>>, vector<1x1x128xf32>
    %85 = vector.shape_cast %84 : vector<1x1x128xf32> to vector<1x128xf32>
    %86 = vector.shape_cast %79 : vector<1x128xf32> to vector<1x1x128xf32>
    tpu.vector_store %arg4[%c0_47, %c1_48, %c0_49], %86 {strides = array<i32>} : memref<1x2x128xf32, #tpu.memory_space<vmem>>, vector<1x1x128xf32>,
    return
  }
  func.func @transform_0(%arg0: i32) -> (i32, i32, i32) {
    %c0_i32 = arith.constant 0 : i32
    %c0_i32_0 = arith.constant 0 : i32
    %c0_i32_1 = arith.constant 0 : i32
    return %arg0, %c0_i32, %c0_i32_0 : i32, i32, i32
  }
  func.func @transform_1(%arg0: i32) -> (i32, i32, i32) {
    %c0_i32 = arith.constant 0 : i32
    %c0_i32_0 = arith.constant 0 : i32
    %c0_i32_1 = arith.constant 0 : i32
    %c0_i32_2 = arith.constant 0 : i32
    return %c0_i32, %c0_i32_0, %c0_i32_1 : i32, i32, i32
  }
  func.func @transform_2(%arg0: i32) -> (i32, i32) {
    %c0_i32 = arith.constant 0 : i32
    %c0_i32_0 = arith.constant 0 : i32
    %c0_i32_1 = arith.constant 0 : i32
    return %c0_i32, %c0_i32_0 : i32, i32
  }
  func.func @transform_3(%arg0: i32) -> (i32, i32, i32) {
    %c0_i32 = arith.constant 0 : i32
    %c0_i32_0 = arith.constant 0 : i32
    %c0_i32_1 = arith.constant 0 : i32
    return %arg0, %c0_i32, %c0_i32_0 : i32, i32, i32
  }
}

</mosaic_0001>

<bundles_post_ra>
// kernel: tpu_custom_call.1
= control target key start
LH: loop header
LB: loop body
LE: loop exit
PB: predicated region body
PF: predicated region fallthrough
CT: control target
= control target key end

     0   :  { %8 = vsyncpa [#allocation3], 0  ;;  %s650_s0 = inlined_call_operand.vmem [shape: bf16[2,10,32], index: 0, kind: input, shape index: {}]   ;;  %s651_s1 = inlined_call_operand.hbm [shape: bf16[3,32,128], index: 1, kind: input, shape index: {}]   ;;  %s652_s2 = inlined_call_operand.vmem [shape: f32[1,128], index: 2, kind: input, shape index: {}]   ;;  %s653_s3 = inlined_call_operand.hbm [shape: f32[1,2,128], index: 3, kind: output, shape index: {}]  }
   0x1   :  { %9 = vsyncpa [#allocation4], 0  ;;  %s593_s12 = smov [#allocation2]  }
   0x2   :  { %s17_s13 = sshll.u32 %s593_s12, 4  ;;  %s18_s13 = int_to_ptr.vmem [resolvable:$true] %s17_s13 }
   0x3   :  { %s557_s14 = scalar_lea.vmem %s18_s13, 768  ;;  %p562_p1 = scmp.lt.s32.totalorder %s18_s13, %s18_s13 }
   0x4   :  { %p558_p0 = scmp.ne.s32.totalorder %s18_s13, %s557_s14  ;;  %p563_p2 = scmp.lt.s32.totalorder %s557_s14, %s557_s14 }
   0x6   :  { %p564_p3 = por %p563_p2, %p562_p1 }
   0x8   :  { %p565_p4 = pnand %p564_p3, %p558_p0 }
   0xa   :  { %568 = shalt.err (!%p565_p4)
}
   0xb   :  { %s594_s15 = smov 64   ;;  %s595_s16 = smov 4  }
   0xc   :  { %23 = dma.hbm_to_vmem [thread:$0]  %s651_s1, 768, %s18_s13, [#allocation3], %s594_s15, %s594_s15, %s595_s16  }
   0xd   :  { %589 = dma.done.wait [#allocation3], 768  }
   0xe   :  { %590 = vsyncadd [#allocation3], 4294966528  ;;  %v596_v0 = vmov 0.0   ;;  %vm597_vm0 = vmmov 0   ;;  %v537_v1 = vld [vmem:[#allocation2 + $0x8] sm:$0xff]   ;;  %v538_v2 = vld [vmem:[#allocation2 + $0x18] sm:$0xff]  }
   0xf   :  { %483 = vmatprep.subr.bf16.mxu0 %v596_v0  ;;  %491 = vmatprep.subr.bf16.mxu1 %v596_v0  ;;  %v539_v3 = vld [vmem:[#allocation2] sm:$0xff]   ;;  %v540_v4 = vld [vmem:[#allocation2 + $0x10] sm:$0xff]   ;;  %vm53_vm1 = vcmask 261120   ;;  %v542_v6 = vld [vmem:[#allocation2 + $0x28] sm:$0xff]   ;;  %vm157_vm2 = vcmask 1046528   ;;  %vm223_vm3 = vcmask 1045504  }
  0x10   :  { %487 = vmatprep.mubr.msk.bf16.mxu0 %vm597_vm0, %v596_v0  ;;  %495 = vmatprep.mubr.msk.bf16.mxu1 %vm597_vm0, %v596_v0  ;;  %v541_v5 = vld [vmem:[%s650_s0] sm:$0x1f]   ;;  %v544_v8 = vld [vmem:[%s650_s0 + $0x8] sm:$0x1f]  }
  0x11   :  { %484 = vmatpush3.bf16.msra.mxu0 %v537_v1  ;;  %492 = vmatpush3.bf16.msra.mxu1 %v538_v2  ;;  %v543_v7 = vld [vmem:[#allocation2 + $0x20] sm:$0xff]  }
  0x12   :  { %485 = vmatprep.subr.bf16.mxu0 %v596_v0  ;;  %493 = vmatprep.subr.bf16.mxu1 %v596_v0  ;;  %v458_v31 = vld [vmem:[%s652_s2] ss:$0 sm:$0xff]  ;;  %s598_s2 = smov [#allocation5]  }
  0x13   :  { %s439_s23 = sshll.u32 %s598_s2, 4  ;;  %s440_s23 = int_to_ptr.vmem [resolvable:$true] %s439_s23 }
  0x14   :  { %s569_s24 = scalar_lea.vmem %s440_s23, 32  ;;  %p574_p6 = scmp.lt.s32.totalorder %s440_s23, %s440_s23 }
  0x15   :  { %486 = vmatpush3.bf16.msra.mxu0 %v539_v3  ;;  %494 = vmatpush3.bf16.msra.mxu1 %v540_v4  ;;  %p570_p5 = scmp.ne.s32.totalorder %s440_s23, %s569_s24  ;;  %p575_p7 = scmp.lt.s32.totalorder %s569_s24, %s569_s24 }
  0x16   :  { %499 = vmatprep.subr.bf16.mxu0 %v596_v0  ;;  %507 = vmatprep.subr.bf16.mxu1 %v596_v0 }
  0x17   :  { %p576_p8 = por %p575_p7, %p574_p6 }
  0x18   :  { %488 = vmatmul.mubr.msk.bf16.vlgmr.msra.gmra.mxu0 %vm53_vm1, %v541_v5  ;;  %496 = vmatmul.mubr.msk.bf16.vlgmr.msra.gmra.mxu1 %vm53_vm1, %v541_v5 }
  0x19   :  { %500 = vmatpush3.bf16.msra.mxu0 %v542_v6  ;;  %508 = vmatpush3.bf16.msra.mxu1 %v537_v1  ;;  %p577_p9 = pnand %p576_p8, %p570_p5 }
  0x1a   :  { %501 = vmatprep.subr.bf16.mxu0 %v596_v0  ;;  %509 = vmatprep.subr.bf16.mxu1 %v596_v0 }
  0x1b   :  { %503 = vmatprep.mubr.msk.bf16.mxu0 %vm597_vm0, %v596_v0  ;;  %511 = vmatprep.mubr.msk.bf16.mxu1 %vm597_vm0, %v596_v0 }
  0x1d   :  { %502 = vmatpush3.bf16.msra.mxu0 %v543_v7  ;;  %510 = vmatpush3.bf16.msra.mxu1 %v539_v3 }
  0x1e   :  { %515 = vmatprep.subr.bf16.mxu0 %v596_v0  ;;  %523 = vmatprep.subr.bf16.mxu1 %v596_v0 }
  0x20   :  { %504 = vmatmul.mubr.msk.bf16.vlgmr.msra.gmra.mxu0 %vm53_vm1, %v541_v5  ;;  %512 = vmatmul.mubr.msk.bf16.vlgmr.msra.gmra.mxu1 %vm53_vm1, %v544_v8 }
  0x21   :  { %516 = vmatpush3.bf16.msra.mxu0 %v538_v2  ;;  %524 = vmatpush3.bf16.msra.mxu1 %v542_v6 }
  0x22   :  { %517 = vmatprep.subr.bf16.mxu0 %v596_v0  ;;  %525 = vmatprep.subr.bf16.mxu1 %v596_v0 }
  0x23   :  { %519 = vmatprep.mubr.msk.bf16.mxu0 %vm597_vm0, %v596_v0  ;;  %527 = vmatprep.mubr.msk.bf16.mxu1 %vm597_vm0, %v596_v0 }
  0x25   :  { %518 = vmatpush3.bf16.msra.mxu0 %v540_v4  ;;  %526 = vmatpush3.bf16.msra.mxu1 %v543_v7 }
  0x28   :  { %520 = vmatmul.mubr.msk.bf16.vlgmr.msra.gmra.mxu0 %vm53_vm1, %v544_v8  ;;  %528 = vmatmul.mubr.msk.bf16.vlgmr.msra.gmra.mxu1 %vm53_vm1, %v544_v8 }
  0xd8   :  { %v91_v9 = vpop.f32.mrf.mxu0  ;;  %v148_v10 = vpop.f32.mrf.mxu1 }
  0xd9   :  { %v158_v19 = vrot.slane %v148_v10, 1 }
  0xda   :  { %v489_v11 = vpop.f32.mrf.mxu0  ;;  %v497_v12 = vpop.f32.mrf.mxu1 }
  0xdc   :  { %v94_v13 = vpop.f32.mrf.mxu0  ;;  %v151_v14 = vpop.f32.mrf.mxu1 }
  0xdd   :  { %v159_v16 = vrot.slane %v151_v14, 1 }
  0xde   :  { %v490_v15 = vpop.f32.mrf.mxu0  ;;  %v498_v17 = vpop.f32.mrf.mxu1 }
  0xdf   :  { %v160_v22 = vsel %vm157_vm2, %v158_v19, %v159_v16 }
  0xe0   :  { %v214_v18 = vpop.f32.mrf.mxu0  ;;  %v302_v20 = vpop.f32.mrf.mxu1  ;;  %v162_v28 = vadd.f32 %v160_v22, %v91_v9 }
  0xe1   :  { %v224_v25 = vrot.slane %v214_v18, 2 }
  0xe2   :  { %v505_v21 = vpop.f32.mrf.mxu0  ;;  %v513_v23 = vpop.f32.mrf.mxu1 }
  0xe4   :  { %v217_v24 = vpop.f32.mrf.mxu0  ;;  %v305_v27 = vpop.f32.mrf.mxu1 }
  0xe5   :  { %v225_v26 = vrot.slane %v217_v24, 2 }
  0xe6   :  { %v506_v29 = vpop.f32.mrf.mxu0  ;;  %v514_v32 = vpop.f32.mrf.mxu1 }
  0xe7   :  { %v226_v30 = vsel %vm223_vm3, %v224_v25, %v225_v26 }
  0xe8   :  { %v228_v33 = vadd.f32 %v226_v30, %v162_v28  ;;  %v342_v34 = vpop.f32.mrf.mxu0  ;;  %v390_v35 = vpop.f32.mrf.mxu1 }
  0xe9   :  { %v351_v41 = vrot.slane %v342_v34, 1  ;;  %v399_v46 = vrot.slane %v390_v35, 2 }
  0xea   :  { %v236_v36 = vadd.f32 %v458_v31, %v228_v33  ;;  %v521_v37 = vpop.f32.mrf.mxu0  ;;  %v529_v38 = vpop.f32.mrf.mxu1 }
  0xec   :  { %v238_v39 = vmul.f32 0.70710677, %v236_v36  ;;  %v345_v40 = vpop.f32.mrf.mxu0  ;;  %v393_v43 = vpop.f32.mrf.mxu1  ;;  %v237_v55 = vmul.f32 0.5, %v236_v36 }
  0xed   :  { %v352_v42 = vrot.slane %v345_v40, 1  ;;  %v400_v44 = vrot.slane %v393_v43, 2 }
  0xee   :  { %545 = verf.f32 %v238_v39  ;;  %v522_v45 = vpop.f32.mrf.mxu0  ;;  %v530_v48 = vpop.f32.mrf.mxu1 }
  0xef   :  { %v353_v47 = vsel %vm157_vm2, %v351_v41, %v352_v42  ;;  %v401_v50 = vsel %vm223_vm3, %v399_v46, %v400_v44 }
  0xf0   :  { %v355_v49 = vadd.f32 %v353_v47, %v302_v20 }
  0xf2   :  { %v403_v51 = vadd.f32 %v401_v50, %v355_v49 }
  0xf4   :  { %v404_v52 = vadd.f32 %v458_v31, %v403_v51 }
  0xf6   :  { %v406_v53 = vmul.f32 0.70710677, %v404_v52  ;;  %v405_v62 = vmul.f32 0.5, %v404_v52 }
  0xf8   :  { %547 = verf.f32 %v406_v53 }
  0xfb   :  { %v546_v54 = vpop.eup %545 }
  0xfc   :  { %v240_v56 = vadd.f32 1.0, %v546_v54 }
  0xfe   :  { %v241_v57 = vmul.f32 %v240_v56, %v237_v55 }
 0x100   :  { %v242_v58 = vrot.slane %v241_v57, 4 }
 0x102   :  { %v243_v59 = vadd.f32 %v242_v58, %v241_v57 }
 0x104   :  { %v244_v60 = vrot.slane %v243_v59, 2 }
 0x105   :  { %v548_v61 = vpop.eup %547 }
 0x106   :  { %v408_v63 = vadd.f32 1.0, %v548_v61  ;;  %v245_v0 = vadd.f32 %v244_v60, %v243_v59 }
 0x108   :  { %v409_v1 = vmul.f32 %v408_v63, %v405_v62  ;;  %v246_v2 = vrot.slane %v245_v0, 1 }
 0x10a   :  { %v247_v3 = vadd.f32 %v246_v2, %v245_v0  ;;  %v410_v4 = vrot.slane %v409_v1, 4 }
 0x10c   :  { %v248_v5 = vmul.f32 0.125, %v247_v3  ;;  %v411_v6 = vadd.f32 %v410_v4, %v409_v1 }
 0x10e   :  { %v249_v7 = vsub.f32 %v241_v57, %v248_v5  ;;  %v412_v8 = vrot.slane %v411_v6, 2 }
 0x110   :  { %v250_v9 = vmul.f32 %v249_v7, %v249_v7  ;;  %v413_v10 = vadd.f32 %v412_v8, %v411_v6 }
 0x112   :  { %v251_v11 = vrot.slane %v250_v9, 4  ;;  %v414_v12 = vrot.slane %v413_v10, 1 }
 0x114   :  { %v415_v13 = vadd.f32 %v414_v12, %v413_v10  ;;  %v252_v14 = vadd.f32 %v251_v11, %v250_v9 }
 0x116   :  { %v416_v15 = vmul.f32 0.125, %v415_v13  ;;  %v430_v16 = vadd.f32 %v415_v13, %v247_v3  ;;  %v253_v18 = vrot.slane %v252_v14, 2 }
 0x118   :  { %v417_v17 = vsub.f32 %v409_v1, %v416_v15  ;;  %431 = vst [vmem:[#allocation5] sm:$0x1] %v430_v16  ;;  %v254_v21 = vadd.f32 %v253_v18, %v252_v14  ;;  %v425_v24 = vsub.f32 %v416_v15, %v248_v5 }
 0x11a   :  { %v418_v19 = vmul.f32 %v417_v17, %v417_v17  ;;  %v255_v25 = vrot.slane %v254_v21, 1  ;;  %v427_v28 = vmul.f32 %v425_v24, %v425_v24 }
 0x11c   :  { %v419_v20 = vrot.slane %v418_v19, 4  ;;  %v256_v29 = vadd.f32 %v255_v25, %v254_v21  ;;  %v428_v32 = vmul.f32 4.0, %v427_v28 }
 0x11e   :  { %v420_v22 = vadd.f32 %v419_v20, %v418_v19 }
 0x120   :  { %v421_v23 = vrot.slane %v420_v22, 2 }
 0x122   :  { %v422_v26 = vadd.f32 %v421_v23, %v420_v22 }
 0x124   :  { %v423_v27 = vrot.slane %v422_v26, 1 }
 0x126   :  { %v424_v30 = vadd.f32 %v423_v27, %v422_v26 }
 0x128   :  { %v426_v31 = vadd.f32 %v424_v30, %v256_v29 }
 0x12a   :  { %v429_v33 = vadd.f32 %v428_v32, %v426_v31 }
 0x12c   :  { %432 = vst [vmem:[#allocation5 + $0x1] sm:$0x1] %v429_v33 }
 0x12d   :  { %580 = shalt.err (!%p577_p9)
}
 0x12e   :  { %442 = dma.vmem_to_hbm [thread:$0]  %s440_s23, 32, %s653_s3, [#allocation4]  }
 0x12f   :  { %591 = dma.done.wait [#allocation4], 32  }
 0x130   :  { %592 = vsyncadd [#allocation4], 4294967264 }
 0x131   :  { %446 = vsyncpa [#allocation3], 1 }
 0x132   :  { %447 = vsyncpa [#allocation4], 1 }

</bundles_post_ra>
